<compile_context>
chip_gen: v7x
topology: tpu7x:2x2x1
jax: 0.10.0
libtpu: 0.0.40
codegen_flags: <defaults>
</compile_context>

<pallas_src>
import jax
import jax.numpy as jnp
from jax import lax
from jax.experimental import pallas as pl
from jax.experimental.pallas import tpu as pltpu


def _two_layer_fcn_kernel(x_ref, w1_ref, b1_ref, w2_ref, b2_ref, o_ref):
    # x_ref : (tn, F)  node-major input tile (as stored in HBM)
    # w1_ref: (H, F)   full W1 (resident)     b1_ref: (H, tn) native bias tile
    # w2_ref: (C, H)   full W2 (resident)     b2_ref: (C, tn) native bias tile
    # o_ref : (C, tn)  class-major softmax tile of the (C, N) output
    x = x_ref[...]

    # Layer 1: W1 @ X_tile^T -> (H, tn). trans_b dot_general; no data transpose.
    z1 = lax.dot_general(
        w1_ref[...], x,
        dimension_numbers=(((1,), (1,)), ((), ())),
        preferred_element_type=jnp.float32)
    z1 = jnp.maximum(z1 + b1_ref[...], 0.0)

    # Layer 2: W2 @ Z1 -> (C, tn)
    z2 = lax.dot_general(
        w2_ref[...], z1,
        dimension_numbers=(((1,), (0,)), ((), ())),
        preferred_element_type=jnp.float32)
    z2 = jnp.maximum(z2 + b2_ref[...], 0.0)

    # Softmax over classes (sublane axis 0), numerically stable.
    m = jnp.max(z2, axis=0, keepdims=True)
    e = jnp.exp(z2 - m)
    s = jnp.sum(e, axis=0, keepdims=True)
    inv = pl.reciprocal(s, approx=True)      # EUP slot (free after the exp)
    inv = inv * (2.0 - s * inv)              # one Newton step -> ~full f32
    o_ref[...] = (e * inv).astype(o_ref.dtype)


def _round_up(v, m):
    return (v + m - 1) // m * m


def two_layer_fcn(x, w1, b1, w2, b2, *, tile_nodes=16384):
    """x: (N, F); w1: (H, F); b1: (H, N); w2: (C, H); b2: (C, N) -> (N, C)."""
    n, f = x.shape
    h = w1.shape[0]
    c = w2.shape[0]

    # --- Per-generation VMEM budget -------------------------------------
    # v5e/v6e: 128 MiB physical, v7x: 64 MiB.  Use 75% as the scoped limit,
    # leaving headroom for compiler internal scratch.
    try:
        phys_vmem = pltpu.get_tpu_info().vmem_capacity_bytes
    except Exception:  # pragma: no cover - fall back to the smallest (v7x)
        phys_vmem = 64 * 1024 * 1024
    vmem_budget = (phys_vmem * 3) // 4

    # --- Correct per-node VMEM accounting (double-buffered blocks) -------
    #   x  block (tn, F): F lane-padded to 128  -> round_up(F,128)*4 B / node
    #   b1 block (H, tn): H sublane-padded to 8 -> round_up(H,8)*4  B / node
    #   b2 block (C, tn): C sublane-padded to 8 -> round_up(C,8)*4  B / node
    #   out block (C, tn):                      -> round_up(C,8)*4  B / node
    per_node_buf_bytes = 4 * (_round_up(f, 128) + _round_up(h, 8)
                              + 2 * _round_up(c, 8))
    per_node_bytes = 2 * per_node_buf_bytes        # double buffering
    resident_bytes = 2 * 4 * (_round_up(h, 8) * _round_up(f, 128)
                              + _round_up(c, 8) * _round_up(h, 128))
    usable = max(vmem_budget - resident_bytes, 128 * per_node_bytes)
    tn_vmem_cap = max(128, (usable // per_node_bytes) // 128 * 128)

    # --- Node-tile selection ---------------------------------------------
    tn = min(tile_nodes, tn_vmem_cap)
    # Keep >= 2 grid steps for large N so both v7x TensorCores get node tiles.
    if n >= 2 * 128:
        tn = min(tn, 128 * pl.cdiv(n, 2 * 128))
    if tn >= n:
        tn = n                                  # single full-extent block
    else:
        tn = max(128, (tn // 128) * 128)        # lane-axis alignment
    grid = (pl.cdiv(n, tn),)

    # --- Cost hint: memory-bound custom call ------------------------------
    cost = pl.CostEstimate(
        flops=2 * n * (h * f + c * h),
        transcendentals=n * c,
        bytes_accessed=4 * (n * (f + h + 2 * c) + h * f + c * h),
    )

    out_cn = pl.pallas_call(
        _two_layer_fcn_kernel,
        out_shape=jax.ShapeDtypeStruct((c, n), x.dtype),
        grid_spec=pltpu.PrefetchScalarGridSpec(
            num_scalar_prefetch=0,
            grid=grid,
            in_specs=[
                pl.BlockSpec((tn, f), lambda i: (i, 0)),  # X node tile
                pl.BlockSpec((h, f), lambda i: (0, 0)),   # W1 (resident)
                pl.BlockSpec((h, tn), lambda i: (0, i)),  # b1, native layout
                pl.BlockSpec((c, h), lambda i: (0, 0)),   # W2 (resident)
                pl.BlockSpec((c, tn), lambda i: (0, i)),  # b2, native layout
            ],
            out_specs=pl.BlockSpec((c, tn), lambda i: (0, i)),  # lane-dense
        ),
        compiler_params=pltpu.CompilerParams(
            dimension_semantics=("parallel",),     # megacore-shard node tiles
            vmem_limit_bytes=vmem_budget),
        cost_estimate=cost,
    )(x, w1, b1, w2, b2)

    # Module returns (num_nodes, num_classes); this tiny (C, N) -> (N, C)
    # transpose is kept only for API parity with the PyTorch module.
    return jnp.transpose(out_cn)


def _reference(x, w1, b1, w2, b2):
    z1 = jnp.maximum(x @ w1.T + b1.T, 0.0)
    z2 = jnp.maximum(z1 @ w2.T + b2.T, 0.0)
    return jax.nn.softmax(z2, axis=-1)


def _init_params(key, num_classes, num_features, num_nodes):
    """Deterministic synthetic params matching the module's shapes/scale."""
    h = num_features // 4
    k1, k2, k3, k4 = jax.random.split(key, 4)
    w1 = jax.random.normal(k1, (h, num_features), jnp.float32) / (h * num_features)
    b1 = jax.random.normal(k2, (h, num_nodes), jnp.float32) / (h * num_nodes)
    w2 = jax.random.normal(k3, (num_classes, h), jnp.float32) / (num_classes * h)
    b2 = jax.random.normal(k4, (num_classes, num_nodes), jnp.float32) / (num_classes * num_nodes)
    return w1, b1, w2, b2


if __name__ == "__main__":
    key = jax.random.PRNGKey(0)

    # Case 1: module's small reference shapes (single full-array block).
    # Case 2: multi-step grid with forced small tile (pipelining path).
    # Case 3: ragged N (remainder block handled by cdiv + block masking).
    # Case 4: default tile selection (VMEM-cap + >=2-step logic exercised).
    cases = [
        dict(num_classes=4, num_features=32, num_nodes=8, tile_nodes=16384),
        dict(num_classes=4, num_features=32, num_nodes=384, tile_nodes=128),
        dict(num_classes=4, num_features=32, num_nodes=200, tile_nodes=128),
        dict(num_classes=4, num_features=32, num_nodes=1024, tile_nodes=16384),
    ]
    for cfg in cases:
        key, kx, kp = jax.random.split(key, 3)
        x = jax.random.normal(
            kx, (cfg["num_nodes"], cfg["num_features"]), jnp.float32)
        w1, b1, w2, b2 = _init_params(
            kp, cfg["num_classes"], cfg["num_features"], cfg["num_nodes"])

        out = two_layer_fcn(x, w1, b1, w2, b2, tile_nodes=cfg["tile_nodes"])
        out = jax.block_until_ready(out)

        ref = _reference(x, w1, b1, w2, b2)
        assert out.shape == (cfg["num_nodes"], cfg["num_classes"]), cfg
        assert jnp.allclose(out, ref, atol=1e-4, rtol=1e-4), cfg
        assert jnp.allclose(jnp.sum(out, axis=-1), 1.0, atol=1e-4), cfg

    print("KERNEL_OK")
</pallas_src>

<mosaic_0001>
module attributes {stable_mosaic.version = 11 : i64} {
  func.func @_two_layer_fcn_kernel(%arg0: i32, %arg1: memref<8x32xf32, #tpu.memory_space<vmem>>, %arg2: memref<8x32xf32, #tpu.memory_space<vmem>>, %arg3: memref<8x8xf32, #tpu.memory_space<vmem>>, %arg4: memref<4x8xf32, #tpu.memory_space<vmem>>, %arg5: memref<4x8xf32, #tpu.memory_space<vmem>>, %arg6: memref<4x8xf32, #tpu.memory_space<vmem>>) attributes {dimension_semantics = [#tpu.dimension_semantics<parallel>], iteration_bounds = array<i64: 1>, scalar_prefetch = 0 : i64, scratch_operands = 0 : i64, tpu.core_type = #tpu.core_type<tc>, window_params = [{transform_indices = @transform_0, window_bounds = array<i64: 8, 32>}, {pipeline_mode = #tpu.pipeline_mode<synchronous>, transform_indices = @transform_1, window_bounds = array<i64: 8, 32>}, {transform_indices = @transform_2, window_bounds = array<i64: 8, 8>}, {pipeline_mode = #tpu.pipeline_mode<synchronous>, transform_indices = @transform_3, window_bounds = array<i64: 4, 8>}, {transform_indices = @transform_4, window_bounds = array<i64: 4, 8>}, {transform_indices = @transform_5, window_bounds = array<i64: 4, 8>}]} {
    %c0 = arith.constant 0 : index
    %c0_0 = arith.constant 0 : index
    %0 = vector.load %arg1[%c0, %c0_0] : memref<8x32xf32, #tpu.memory_space<vmem>>, vector<8x32xf32>
    %c0_1 = arith.constant 0 : index
    %c0_2 = arith.constant 0 : index
    %1 = vector.load %arg2[%c0_1, %c0_2] : memref<8x32xf32, #tpu.memory_space<vmem>>, vector<8x32xf32>
    %cst = arith.constant dense<0.000000e+00> : vector<8x8xf32>
    %2 = tpu.matmul %1, %0, %cst {dimension_numbers = #tpu.dot_dimension_numbers<[1], [1], [0], [0], [0, 0, 1, 0], [], []>} : vector<8x32xf32>, vector<8x32xf32>, vector<8x8xf32> -> vector<8x8xf32>
    %c0_3 = arith.constant 0 : index
    %c0_4 = arith.constant 0 : index
    %3 = vector.load %arg3[%c0_3, %c0_4] : memref<8x8xf32, #tpu.memory_space<vmem>>, vector<8x8xf32>
    %4 = arith.addf %2, %3 : vector<8x8xf32>
    %cst_5 = arith.constant 0.000000e+00 : f32
    %5 = vector.broadcast %cst_5 : f32 to vector<8x8xf32>
    %6 = arith.maximumf %4, %5 : vector<8x8xf32>
    %c0_6 = arith.constant 0 : index
    %c0_7 = arith.constant 0 : index
    %7 = vector.load %arg4[%c0_6, %c0_7] : memref<4x8xf32, #tpu.memory_space<vmem>>, vector<4x8xf32>
    %cst_8 = arith.constant dense<0.000000e+00> : vector<4x8xf32>
    %8 = tpu.matmul %7, %6, %cst_8 {dimension_numbers = #tpu.dot_dimension_numbers<[1], [0], [0], [1], [0, 0, 1, 1], [], []>} : vector<4x8xf32>, vector<8x8xf32>, vector<4x8xf32> -> vector<4x8xf32>
    %c0_9 = arith.constant 0 : index
    %c0_10 = arith.constant 0 : index
    %9 = vector.load %arg5[%c0_9, %c0_10] : memref<4x8xf32, #tpu.memory_space<vmem>>, vector<4x8xf32>
    %10 = arith.addf %8, %9 : vector<4x8xf32>
    %cst_11 = arith.constant 0.000000e+00 : f32
    %11 = vector.broadcast %cst_11 : f32 to vector<4x8xf32>
    %12 = arith.maximumf %10, %11 : vector<4x8xf32>
    %cst_12 = arith.constant dense<0xFF800000> : vector<8xf32>
    %13 = vector.multi_reduction <maximumf>, %12, %cst_12 [0] : vector<4x8xf32> to vector<8xf32>
    %14 = vector.shape_cast %13 : vector<8xf32> to vector<1x8xf32>
    %15 = vector.broadcast %14 : vector<1x8xf32> to vector<4x8xf32>
    %16 = arith.subf %12, %15 : vector<4x8xf32>
    %17 = math.exp %16 : vector<4x8xf32>
    %cst_13 = arith.constant dense<0.000000e+00> : vector<8xf32>
    %18 = vector.multi_reduction <add>, %17, %cst_13 [0] : vector<4x8xf32> to vector<8xf32>
    %19 = vector.shape_cast %18 : vector<8xf32> to vector<1x8xf32>
    %20 = tpu.reciprocal %19 {approx = true} : vector<1x8xf32> -> vector<1x8xf32>
    %21 = arith.mulf %19, %20 : vector<1x8xf32>
    %cst_14 = arith.constant 2.000000e+00 : f32
    %22 = vector.broadcast %cst_14 : f32 to vector<1x8xf32>
    %23 = arith.subf %22, %21 : vector<1x8xf32>
    %24 = arith.mulf %20, %23 : vector<1x8xf32>
    %25 = vector.broadcast %24 : vector<1x8xf32> to vector<4x8xf32>
    %26 = arith.mulf %17, %25 : vector<4x8xf32>
    %c0_15 = arith.constant 0 : index
    %c0_16 = arith.constant 0 : index
    %27 = vector.load %arg6[%c0_15, %c0_16] : memref<4x8xf32, #tpu.memory_space<vmem>>, vector<4x8xf32>
    tpu.vector_store %arg6[%c0_15, %c0_16], %26 {strides = array<i32>} : memref<4x8xf32, #tpu.memory_space<vmem>>, vector<4x8xf32>,
    return
  }
  func.func @transform_0(%arg0: i32) -> (i32, i32) {
    %c0_i32 = arith.constant 0 : i32
    %c0_i32_0 = arith.constant 0 : i32
    return %arg0, %c0_i32 : i32, i32
  }
  func.func @transform_1(%arg0: i32) -> (i32, i32) {
    %c0_i32 = arith.constant 0 : i32
    %c0_i32_0 = arith.constant 0 : i32
    %c0_i32_1 = arith.constant 0 : i32
    return %c0_i32, %c0_i32_0 : i32, i32
  }
  func.func @transform_2(%arg0: i32) -> (i32, i32) {
    %c0_i32 = arith.constant 0 : i32
    %c0_i32_0 = arith.constant 0 : i32
    return %c0_i32, %arg0 : i32, i32
  }
  func.func @transform_3(%arg0: i32) -> (i32, i32) {
    %c0_i32 = arith.constant 0 : i32
    %c0_i32_0 = arith.constant 0 : i32
    %c0_i32_1 = arith.constant 0 : i32
    return %c0_i32, %c0_i32_0 : i32, i32
  }
  func.func @transform_4(%arg0: i32) -> (i32, i32) {
    %c0_i32 = arith.constant 0 : i32
    %c0_i32_0 = arith.constant 0 : i32
    return %c0_i32, %arg0 : i32, i32
  }
  func.func @transform_5(%arg0: i32) -> (i32, i32) {
    %c0_i32 = arith.constant 0 : i32
    %c0_i32_0 = arith.constant 0 : i32
    return %c0_i32, %arg0 : i32, i32
  }
}

</mosaic_0001>

<bundles_post_ra>
// kernel: tpu_custom_call.1
= control target key start
LH: loop header
LB: loop body
LE: loop exit
PB: predicated region body
PF: predicated region fallthrough
CT: control target
= control target key end

     0   :  { %10 = vsyncpa [#allocation3], 0  ;;  %s468_s0 = inlined_call_operand.hbm [shape: f32[8,32], index: 0, kind: input, shape index: {}]   ;;  %s469_s1 = inlined_call_operand.hbm [shape: f32[8,32], index: 1, kind: input, shape index: {}]   ;;  %s470_s2 = inlined_call_operand.hbm [shape: f32[8,8], index: 2, kind: input, shape index: {}]   ;;  %s471_s3 = inlined_call_operand.vmem [shape: f32[4,8], index: 3, kind: input, shape index: {}]   ;;  %s472_s4 = inlined_call_operand.vmem [shape: f32[4,8], index: 4, kind: input, shape index: {}]   ;;  %s473_s5 = inlined_call_operand.hbm [shape: f32[4,8], index: 5, kind: output, shape index: {}]  }
   0x1   :  { %11 = vsyncpa [#allocation6], 0 }
   0x2   :  { %12 = vsyncpa [#allocation4], 0  ;;  %s375_s18 = smov [#allocation5]   ;;  %s376_s20 = smov [#allocation2]  }
   0x3   :  { %s29_s19 = sshll.u32 %s375_s18, 4  ;;  %s19_s21 = sshll.u32 %s376_s20, 4  ;;  %s30_s19 = int_to_ptr.vmem [resolvable:$true] %s29_s19  ;;  %s20_s21 = int_to_ptr.vmem [resolvable:$true] %s19_s21 }
   0x4   :  { %s281_s24 = scalar_lea.hbm %s469_s1, 128 }
   0x5   :  { %p282_p0 = scmp.ne.s32.totalorder %s469_s1, %s281_s24  ;;  %p285_p1 = scmp.lt.u32.totalorder %s281_s24, %s469_s1 }
   0x7   :  { %p287_p2 = pnand %p285_p1, %p282_p0 }
   0x9   :  { %290 = shalt.err (!%p287_p2)
}
   0xa   :  { %s291_s29 = scalar_lea.vmem %s30_s19, 128  ;;  %p296_p4 = scmp.lt.s32.totalorder %s30_s19, %s30_s19 }
   0xb   :  { %p292_p3 = scmp.ne.s32.totalorder %s30_s19, %s291_s29  ;;  %p297_p5 = scmp.lt.s32.totalorder %s291_s29, %s291_s29 }
   0xd   :  { %p298_p6 = por %p297_p5, %p296_p4 }
   0xf   :  { %p299_p7 = pnand %p298_p6, %p292_p3 }
  0x11   :  { %302 = shalt.err (!%p299_p7)
}
  0x12   :  { %32 = dma.hbm_to_vmem [thread:$0]  %s469_s1, 128, %s30_s19, [#allocation6]  }
  0x13   :  { %s303_s9 = scalar_lea.hbm %s468_s0, 128 }
  0x14   :  { %p304_p8 = scmp.ne.s32.totalorder %s468_s0, %s303_s9  ;;  %p307_p9 = scmp.lt.u32.totalorder %s303_s9, %s468_s0 }
  0x16   :  { %p309_p10 = pnand %p307_p9, %p304_p8 }
  0x18   :  { %312 = shalt.err (!%p309_p10)
}
  0x19   :  { %s313_s14 = scalar_lea.vmem %s20_s21, 128  ;;  %p318_p12 = scmp.lt.s32.totalorder %s20_s21, %s20_s21 }
  0x1a   :  { %p314_p11 = scmp.ne.s32.totalorder %s20_s21, %s313_s14  ;;  %p319_p13 = scmp.lt.s32.totalorder %s313_s14, %s313_s14 }
  0x1c   :  { %p320_p0 = por %p319_p13, %p318_p12 }
  0x1e   :  { %p321_p1 = pnand %p320_p0, %p314_p11 }
  0x20   :  { %324 = shalt.err (!%p321_p1)
}
  0x21   :  { %22 = dma.hbm_to_vmem [thread:$0]  %s468_s0, 128, %s20_s21, [#allocation3]  }
  0x22   :  { %s377_s16 = smov [#allocation7]   ;;  %s325_s20 = scalar_lea.hbm %s470_s2, 128 }
  0x23   :  { %s39_s17 = sshll.u32 %s377_s16, 4  ;;  %p326_p2 = scmp.ne.s32.totalorder %s470_s2, %s325_s20  ;;  %s40_s17 = int_to_ptr.vmem [resolvable:$true] %s39_s17 }
  0x24   :  { %p329_p3 = scmp.lt.u32.totalorder %s325_s20, %s470_s2 }
  0x26   :  { %p331_p4 = pnand %p329_p3, %p326_p2 }
  0x28   :  { %334 = shalt.err (!%p331_p4)
}
  0x29   :  { %s335_s26 = scalar_lea.vmem %s40_s17, 128  ;;  %p340_p6 = scmp.lt.s32.totalorder %s40_s17, %s40_s17 }
  0x2a   :  { %p336_p5 = scmp.ne.s32.totalorder %s40_s17, %s335_s26  ;;  %p341_p7 = scmp.lt.s32.totalorder %s335_s26, %s335_s26 }
  0x2c   :  { %p342_p8 = por %p341_p7, %p340_p6 }
  0x2e   :  { %p343_p9 = pnand %p342_p8, %p336_p5 }
  0x30   :  { %346 = shalt.err (!%p343_p9)
}
  0x31   :  { %42 = dma.hbm_to_vmem [thread:$0]  %s470_s2, 128, %s40_s17, [#allocation6]  }
  0x32   :  { %369 = dma.done.wait [#allocation3], 128  }
  0x33   :  { %370 = vsyncadd [#allocation3], 4294967168 }
  0x34   :  { %371 = dma.done.wait [#allocation6], 256  }
  0x35   :  { %372 = vsyncadd [#allocation6], 4294967040  ;;  %v378_v0 = vmov 0.0   ;;  %vm379_vm0 = vmmov 0   ;;  %vm59_vm1 = vcmask 261120   ;;  %v56_v1 = vld [vmem:[#allocation2] sm:$0xff] }
  0x36   :  { %261 = vmatprep.subr.mxu0 %v378_v0  ;;  %263 = vmatprep.mubr.msk.f32.mxu0 %vm379_vm0, %v378_v0  ;;  %v57_v2 = vld [vmem:[#allocation5] sm:$0xff]  ;;  %v58_v3 = vld [vmem:[#allocation7] sm:$0xff]  ;;  %v137_v8 = vld [vmem:[%s471_s3] sm:$0xf]  ;;  %vm139_vm2 = vcmask 64512   ;;  %vm214_vm3 = vcmask 60416  }
  0x37   :  { %266 = vmatprep.subr.mxu1 %v378_v0  ;;  %268 = vmatprep.mubr.msk.f32.mxu1 %vm379_vm0, %v378_v0  ;;  %v138_v9 = vld [vmem:[%s472_s4] sm:$0xf]  ;;  %s380_s3 = smov [#allocation8]  }
  0x38   :  { %262 = vmatpush3.xpose.msk.msra.mxu0 %vm59_vm1, %v56_v1  ;;  %s244_s4 = sshll.u32 %s380_s3, 4  ;;  %s245_s4 = int_to_ptr.vmem [resolvable:$true] %s244_s4 }
  0x39   :  { %s347_s30 = scalar_lea.vmem %s245_s4, 64  ;;  %p352_p11 = scmp.lt.s32.totalorder %s245_s4, %s245_s4 }
  0x3a   :  { %p348_p10 = scmp.ne.s32.totalorder %s245_s4, %s347_s30  ;;  %p353_p12 = scmp.lt.s32.totalorder %s347_s30, %s347_s30 }
  0x3b   :  { %264 = vmatmul.mubr.msk.f32.vlgmr.msra.gmra.mrb[0].mxu0 %vm59_vm1, %v57_v2 }
  0x3c   :  { %p354_p13 = por %p353_p12, %p352_p11 }
  0x3e   :  { %p355_p0 = pnand %p354_p13, %p348_p10 }
 0x10e   :  { %v132_v4 = vpop.f32.mrb[0].mxu0 }
 0x10f   :  { %v133_v5 = vadd.f32 %v132_v4, %v58_v3  ;;  %v265_v6 = vpop.f32.mrb[1].mxu0 }
 0x111   :  { %v136_v7 = vmax.f32 %v133_v5, 0.0 }
 0x113   :  { %267 = vmatpush3.msra.mxu1 %v136_v7 }
 0x114   :  { %269 = vmatmul.mubr.msk.f32.vlgmr.msra.gmra.mrb[0].mxu1 %vm139_vm2, %v137_v8 }
 0x1e7   :  { %v209_v10 = vpop.f32.mrb[0].mxu1 }
 0x1e8   :  { %v210_v11 = vadd.f32 %v209_v10, %v138_v9  ;;  %v270_v12 = vpop.f32.mrb[1].mxu1 }
 0x1ea   :  { %v213_v13 = vmax.f32 %v210_v11, 0.0 }
 0x1ec   :  { %v215_v14 = vsel %vm214_vm3, %v213_v13, -inf }
 0x1ed   :  { %v216_v15 = vrot.slane %v215_v14, 4 }
 0x1ef   :  { %v217_v16 = vmax.f32 %v215_v14, %v216_v15 }
 0x1f1   :  { %v218_v17 = vrot.slane %v217_v16, 2 }
 0x1f3   :  { %v219_v18 = vmax.f32 %v217_v16, %v218_v17 }
 0x1f5   :  { %v220_v19 = vrot.slane %v219_v18, 1 }
 0x1f7   :  { %v221_v20 = vmax.f32 %v219_v18, %v220_v19 }
 0x1f9   :  { %v222_v21 = vsub.f32 %v213_v13, %v221_v20 }
 0x1fb   :  { %v223_v22 = vmul.f32 1.442695, %v222_v21 }
 0x1fd   :  { %277 = vpow2.f32 %v223_v22 }
 0x207   :  { %v278_v23 = vpop.eup %277 }
 0x208   :  { %v225_v24 = vsel %vm214_vm3, %v278_v23, 0.0 }
 0x209   :  { %v226_v25 = vrot.slane %v225_v24, 4 }
 0x20b   :  { %v227_v26 = vadd.f32 %v226_v25, %v225_v24 }
 0x20d   :  { %v228_v27 = vrot.slane %v227_v26, 2 }
 0x20f   :  { %v229_v28 = vadd.f32 %v228_v27, %v227_v26 }
 0x211   :  { %v230_v29 = vrot.slane %v229_v28, 1 }
 0x213   :  { %v231_v30 = vadd.f32 %v230_v29, %v229_v28 }
 0x215   :  { %279 = vrcp.f32 %v231_v30 }
 0x21f   :  { %v280_v31 = vpop.eup %279 }
 0x220   :  { %v233_v32 = vmul.f32 %v280_v31, %v231_v30 }
 0x222   :  { %v234_v33 = vsub.f32 2.0, %v233_v32 }
 0x224   :  { %v235_v34 = vmul.f32 %v280_v31, %v234_v33 }
 0x226   :  { %v236_v35 = vmul.f32 %v278_v23, %v235_v34 }
 0x228   :  { %237 = vst.msk [vmem:[#allocation8] sm:$0xf] %vm214_vm3, %v236_v35 }
 0x229   :  { %358 = shalt.err (!%p355_p0)
}
 0x22a   :  { %s359_s8 = scalar_lea.hbm %s473_s5, 64 }
 0x22b   :  { %p360_p1 = scmp.ne.s32.totalorder %s473_s5, %s359_s8  ;;  %p363_p2 = scmp.lt.u32.totalorder %s359_s8, %s473_s5 }
 0x22d   :  { %p365_p3 = pnand %p363_p2, %p360_p1 }
 0x22f   :  { %368 = shalt.err (!%p365_p3)
}
 0x230   :  { %247 = dma.vmem_to_hbm [thread:$0]  %s245_s4, 64, %s473_s5, [#allocation4]  }
 0x231   :  { %373 = dma.done.wait [#allocation4], 64  }
 0x232   :  { %374 = vsyncadd [#allocation4], 4294967232 }
 0x233   :  { %251 = vsyncpa [#allocation3], 1 }
 0x234   :  { %252 = vsyncpa [#allocation6], 1 }
 0x235   :  { %253 = vsyncpa [#allocation4], 1 }

</bundles_post_ra>
